<compile_context>
chip_gen: v7x
topology: tpu7x:2x2x1
jax: 0.10.0
libtpu: 0.0.40
codegen_flags: <defaults>
</compile_context>

<pallas_src>
import jax
import jax.numpy as jnp
from jax import lax
from jax.experimental import pallas as pl
from jax.experimental.pallas import tpu as pltpu

KSIZE = 31     # avg_pool2d kernel_size
RADIUS = 15    # avg_pool2d padding
NEG = -1.0e9   # pad logit: sigmoid==0, bce==0 -> padded pixels contribute 0 to sums


def _structure_loss_kernel(bh_ref, bw_ref, pred_ref, mask_ref, out_ref):
    # bh_ref   : (Hp, Hp) bf16 band-of-ones (|i-j| <= 15), resident via constant index_map
    # bw_ref   : (Wp, Wp) bf16 band-of-ones
    # pred_ref : (B, Hp, Wp) f32 logits
    # mask_ref : (B, Hp, Wp) bf16 mask (0/1 -> exact in bf16)
    # out_ref  : (B, 1, 3)  f32 -> per image [bce_sum, inter, union]
    B = pred_ref.shape[0]
    inv_k2 = 1.0 / float(KSIZE * KSIZE)

    bh = bh_ref[...]
    bw = bw_ref[...]
    lane = jax.lax.broadcasted_iota(jnp.int32, (1, 3), 1)   # hoisted out of the loop

    def body(b, carry):
        x = pred_ref[b]                        # (Hp, Wp) f32
        m_bf = mask_ref[b]                     # (Hp, Wp) bf16
        m = m_bf.astype(jnp.float32)

        # 31x31 box-sum pool as two banded matmuls; bf16 operands are bit-exact
        # here (0/1 inputs, integer partial sums <= 31, f32 MXU accumulation).
        t = jnp.dot(m_bf, bw, preferred_element_type=jnp.float32)          # W-side
        pooled = jnp.dot(bh, t.astype(jnp.bfloat16),
                         preferred_element_type=jnp.float32) * inv_k2       # H-side

        weit = 1.0 + 5.0 * jnp.abs(pooled - m)

        # BCE-with-logits and sigmoid share a single exp; the divide becomes an
        # EUP reciprocal (approx; well inside the 1e-3 tolerance used here).
        t_exp = jnp.exp(-jnp.abs(x))
        bce = jnp.maximum(x, 0.0) - x * m + jnp.log1p(t_exp)
        r = pl.reciprocal(1.0 + t_exp, approx=True)
        sig = jnp.where(x >= 0.0, r, t_exp * r)               # sigmoid(x)

        def _s(v):                             # (Hp, Wp) -> (1, 1)
            return jnp.sum(jnp.sum(v, axis=1, keepdims=True), axis=0, keepdims=True)

        bce_s = _s(bce)
        inter_s = _s(sig * m * weit)
        union_s = _s((sig + m) * weit)

        # One (1,3) store per image instead of three single-lane partial stores.
        row = jnp.where(lane == 0, bce_s, jnp.where(lane == 1, inter_s, union_s))
        out_ref[b] = row
        return carry

    lax.fori_loop(0, B, body, 0)


def _round_up(x, m):
    return -(-x // m) * m


def _vmem_budgets():
    """Return (per-block VMEM budget, pallas vmem_limit_bytes) per TPU generation."""
    cap = 64 * 1024 * 1024
    try:
        info = pltpu.get_tpu_info()
        cap = int(getattr(info, "vmem_capacity_bytes", cap) or cap)
    except Exception:
        pass
    if cap >= 100 * 1024 * 1024:                   # v5e / v6e: 128 MiB physical
        return 56 * 1024 * 1024, 96 * 1024 * 1024
    return 24 * 1024 * 1024, 44 * 1024 * 1024      # v7x: 64 MiB physical


def _pick_batch(nc, hp, wp, budget_bytes):
    # Marginal VMEM per image in the block: pred f32 + mask bf16, double-buffered.
    per_img = (4 + 2) * 2 * hp * wp
    # Fixed: ~6 live (Hp,Wp) f32 temporaries + double-buffered bf16 band matrices.
    fixed = 6 * hp * wp * 4 + 2 * 2 * (hp * hp + wp * wp)
    avail = max(budget_bytes - fixed, per_img)
    bsz = max(1, min(nc, avail // per_img, 32))
    if nc >= 2:                                    # keep >= 2 grid steps (v7x has 2 TCs)
        bsz = min(bsz, -(-nc // 2))
    return int(bsz)


def structure_loss_pallas(pred, mask, weight=1.0):
    n, c, h, w = pred.shape
    nc = n * c

    # Lane/sublane-friendly spatial padding.  Zero-padding the mask leaves the
    # count_include_pad=True box sums at real pixels unchanged; padding pred
    # with a large negative logit makes every padded pixel contribute exactly 0
    # to the bce / inter / union sums (no extra masking pass needed).
    hp = _round_up(h, 8)
    wp = _round_up(w, 128) if w > 128 else w

    block_budget, vmem_limit = _vmem_budgets()
    bsz = _pick_batch(nc, hp, wp, block_budget)
    nc_pad = _round_up(nc, bsz)
    grid = (nc_pad // bsz,)

    p = pred.reshape(nc, h, w).astype(jnp.float32)
    m = mask.reshape(nc, h, w).astype(jnp.bfloat16)   # 0/1 mask: exact in bf16
    if (nc_pad, hp, wp) != (nc, h, w):
        pad = ((0, nc_pad - nc), (0, hp - h), (0, wp - w))
        p = jnp.pad(p, pad, constant_values=NEG)
        m = jnp.pad(m, pad, constant_values=0.0)

    # Band-of-ones matrices built once in the wrapper; constant index_map keeps
    # them resident in VMEM across all grid steps (no per-step rebuild / re-DMA).
    def _band(size):
        i = jnp.arange(size, dtype=jnp.int32)
        return (jnp.abs(i[:, None] - i[None, :]) <= RADIUS).astype(jnp.bfloat16)

    bh = _band(hp)
    bw = _band(wp)

    band_h_spec = pl.BlockSpec((hp, hp), lambda i: (0, 0))
    band_w_spec = pl.BlockSpec((wp, wp), lambda i: (0, 0))
    img_spec = pl.BlockSpec((bsz, hp, wp), lambda i: (i, 0, 0))
    out_spec = pl.BlockSpec((bsz, 1, 3), lambda i: (i, 0, 0))
    out_sds = jax.ShapeDtypeStruct((nc_pad, 1, 3), jnp.float32)

    cost = pl.CostEstimate(
        flops=int(2 * nc_pad * hp * wp * (hp + wp) + 25 * nc_pad * hp * wp),
        transcendentals=int(2 * nc_pad * hp * wp),
        bytes_accessed=int(nc_pad * hp * wp * (4 + 2)
                           + 2 * (hp * hp + wp * wp) + nc_pad * 3 * 4),
    )

    out = pl.pallas_call(
        _structure_loss_kernel,
        out_shape=out_sds,
        grid_spec=pltpu.PrefetchScalarGridSpec(
            num_scalar_prefetch=0,
            grid=grid,
            in_specs=[band_h_spec, band_w_spec, img_spec, img_spec],
            out_specs=out_spec,
        ),
        compiler_params=pltpu.CompilerParams(
            dimension_semantics=("parallel",),     # independent images -> megacore
            vmem_limit_bytes=vmem_limit,
        ),
        cost_estimate=cost,
    )(bh, bw, p, m)

    out = out.reshape(nc_pad, 3)[:nc]
    bce_sum = out[:, 0]
    inter = out[:, 1].reshape(n, c)
    union = out[:, 2].reshape(n, c)

    # reduce='none' quirk: the BCE term is the global mean over all real
    # N*C*H*W elements, so the per-(n,c) weit normalisation is a no-op.
    wbce = jnp.sum(bce_sum) / float(nc * h * w)
    wiou = 1.0 - (inter + 1.0) / (union - inter + 1.0)
    return weight * jnp.mean(wbce + wiou)


def structure_loss_ref(pred, mask, weight=1.0):
    # Pure-JAX reference (independent pooling path) for self-checking.
    pooled = lax.reduce_window(
        mask, 0.0, lax.add,
        (1, 1, KSIZE, KSIZE), (1, 1, 1, 1),
        [(0, 0), (0, 0), (RADIUS, RADIUS), (RADIUS, RADIUS)],
    ) / float(KSIZE * KSIZE)
    weit = 1.0 + 5.0 * jnp.abs(pooled - mask)
    bce = jnp.maximum(pred, 0.0) - pred * mask + jnp.log1p(jnp.exp(-jnp.abs(pred)))
    wbce = jnp.mean(bce)   # PyTorch reduce='none' -> legacy reduction='mean'
    sig = jax.nn.sigmoid(pred)
    inter = jnp.sum(sig * mask * weit, axis=(2, 3))
    union = jnp.sum((sig + mask) * weit, axis=(2, 3))
    wiou = 1.0 - (inter + 1.0) / (union - inter + 1.0)
    return weight * jnp.mean(wbce + wiou)


if __name__ == "__main__":
    key = jax.random.PRNGKey(0)
    cases = [
        (2, 4, 16, 16),    # base case
        (2, 3, 13, 136),   # exercises H (13->16) and W (136->256) spatial padding
        (1, 5, 16, 16),    # exercises N*C padding (5 -> 6)
    ]
    for idx, (N, C, H, W) in enumerate(cases):
        key, k1, k2 = jax.random.split(key, 3)
        pred = jax.random.normal(k1, (N, C, H, W), dtype=jnp.float32)
        mask = (jax.random.uniform(k2, (N, C, H, W)) > 0.5).astype(jnp.float32)

        loss = structure_loss_pallas(pred, mask, 1.0)   # StructureLoss(weight=1.0)
        loss = jax.block_until_ready(loss)
        ref = structure_loss_ref(pred, mask, 1.0)

        assert bool(jnp.isfinite(loss)), f"case {idx}: loss is not finite"
        assert bool(jnp.allclose(loss, ref, rtol=1e-3, atol=1e-3)), (idx, loss, ref)
    print("KERNEL_OK")
</pallas_src>

<mosaic_0001>
module attributes {stable_mosaic.version = 11 : i64} {
  func.func @_structure_loss_kernel(%arg0: i32, %arg1: memref<16x16xbf16, #tpu.memory_space<vmem>>, %arg2: memref<16x16xbf16, #tpu.memory_space<vmem>>, %arg3: memref<4x16x16xf32, #tpu.memory_space<vmem>>, %arg4: memref<4x16x16xbf16, #tpu.memory_space<vmem>>, %arg5: memref<4x1x3xf32, #tpu.memory_space<vmem>>) attributes {dimension_semantics = [#tpu.dimension_semantics<parallel>], iteration_bounds = array<i64: 2>, scalar_prefetch = 0 : i64, scratch_operands = 0 : i64, tpu.core_type = #tpu.core_type<tc>, window_params = [{pipeline_mode = #tpu.pipeline_mode<synchronous>, transform_indices = @transform_0, window_bounds = array<i64: 16, 16>}, {pipeline_mode = #tpu.pipeline_mode<synchronous>, transform_indices = @transform_1, window_bounds = array<i64: 16, 16>}, {transform_indices = @transform_2, window_bounds = array<i64: 4, 16, 16>}, {transform_indices = @transform_3, window_bounds = array<i64: 4, 16, 16>}, {transform_indices = @transform_4, window_bounds = array<i64: 4, 1, 3>}]} {
    %c0 = arith.constant 0 : index
    %c0_0 = arith.constant 0 : index
    %0 = vector.load %arg1[%c0, %c0_0] : memref<16x16xbf16, #tpu.memory_space<vmem>>, vector<16x16xbf16>
    %c0_1 = arith.constant 0 : index
    %c0_2 = arith.constant 0 : index
    %1 = vector.load %arg2[%c0_1, %c0_2] : memref<16x16xbf16, #tpu.memory_space<vmem>>, vector<16x16xbf16>
    %2 = tpu.iota {dimensions = array<i32: 1>} : vector<1x3xi32>
    %c0_i32 = arith.constant 0 : i32
    %c4_i32 = arith.constant 4 : i32
    %3 = arith.addi %c0_i32, %c4_i32 : i32
    %c1_i32 = arith.constant 1 : i32
    scf.for %arg6 = %c0_i32 to %3 step %c1_i32  : i32 {
      %4 = arith.index_cast %arg6 : i32 to index
      %c0_4 = arith.constant 0 : index
      %c0_5 = arith.constant 0 : index
      %5 = vector.load %arg3[%4, %c0_4, %c0_5] : memref<4x16x16xf32, #tpu.memory_space<vmem>>, vector<1x16x16xf32>
      %6 = vector.shape_cast %5 : vector<1x16x16xf32> to vector<16x16xf32>
      %7 = arith.index_cast %arg6 : i32 to index
      %c0_6 = arith.constant 0 : index
      %c0_7 = arith.constant 0 : index
      %8 = vector.load %arg4[%7, %c0_6, %c0_7] : memref<4x16x16xbf16, #tpu.memory_space<vmem>>, vector<1x16x16xbf16>
      %9 = vector.shape_cast %8 : vector<1x16x16xbf16> to vector<16x16xbf16>
      %10 = arith.extf %9 : vector<16x16xbf16> to vector<16x16xf32>
      %cst = arith.constant dense<0.000000e+00> : vector<16x16xf32>
      %11 = tpu.matmul %9, %1, %cst {dimension_numbers = #tpu.dot_dimension_numbers<[1], [0], [0], [1], [0, 0, 1, 1], [], []>} : vector<16x16xbf16>, vector<16x16xbf16>, vector<16x16xf32> -> vector<16x16xf32>
      %12 = arith.truncf %11 : vector<16x16xf32> to vector<16x16xbf16>
      %cst_8 = arith.constant dense<0.000000e+00> : vector<16x16xf32>
      %13 = tpu.matmul %0, %12, %cst_8 {dimension_numbers = #tpu.dot_dimension_numbers<[1], [0], [0], [1], [0, 0, 1, 1], [], []>} : vector<16x16xbf16>, vector<16x16xbf16>, vector<16x16xf32> -> vector<16x16xf32>
      %cst_9 = arith.constant 0.00104058278 : f32
      %14 = vector.broadcast %cst_9 : f32 to vector<16x16xf32>
      %15 = arith.mulf %13, %14 : vector<16x16xf32>
      %16 = arith.subf %15, %10 : vector<16x16xf32>
      %17 = math.absf %16 : vector<16x16xf32>
      %cst_10 = arith.constant 5.000000e+00 : f32
      %18 = vector.broadcast %cst_10 : f32 to vector<16x16xf32>
      %19 = arith.mulf %18, %17 : vector<16x16xf32>
      %cst_11 = arith.constant 1.000000e+00 : f32
      %20 = vector.broadcast %cst_11 : f32 to vector<16x16xf32>
      %21 = arith.addf %20, %19 : vector<16x16xf32>
      %22 = math.absf %6 : vector<16x16xf32>
      %cst_12 = arith.constant 0.000000e+00 : f32
      %23 = vector.broadcast %cst_12 : f32 to vector<16x16xf32>
      %24 = arith.subf %23, %22 : vector<16x16xf32>
      %25 = math.exp %24 : vector<16x16xf32>
      %cst_13 = arith.constant 0.000000e+00 : f32
      %26 = vector.broadcast %cst_13 : f32 to vector<16x16xf32>
      %27 = arith.maximumf %6, %26 : vector<16x16xf32>
      %28 = arith.mulf %6, %10 : vector<16x16xf32>
      %29 = arith.subf %27, %28 : vector<16x16xf32>
      %30 = math.log1p %25 : vector<16x16xf32>
      %31 = arith.addf %29, %30 : vector<16x16xf32>
      %cst_14 = arith.constant 1.000000e+00 : f32
      %32 = vector.broadcast %cst_14 : f32 to vector<16x16xf32>
      %33 = arith.addf %32, %25 : vector<16x16xf32>
      %34 = tpu.reciprocal %33 {approx = true} : vector<16x16xf32> -> vector<16x16xf32>
      %cst_15 = arith.constant 0.000000e+00 : f32
      %35 = vector.broadcast %cst_15 : f32 to vector<16x16xf32>
      %36 = arith.cmpf oge, %6, %35 : vector<16x16xf32>
      %37 = arith.mulf %25, %34 : vector<16x16xf32>
      %38 = arith.select %36, %34, %37 : vector<16x16xi1>, vector<16x16xf32>
      %cst_16 = arith.constant dense<0.000000e+00> : vector<16xf32>
      %39 = vector.multi_reduction <add>, %31, %cst_16 [1] : vector<16x16xf32> to vector<16xf32>
      %40 = vector.shape_cast %39 : vector<16xf32> to vector<16x1xf32>
      %cst_17 = arith.constant dense<0.000000e+00> : vector<1xf32>
      %41 = vector.multi_reduction <add>, %40, %cst_17 [0] : vector<16x1xf32> to vector<1xf32>
      %42 = vector.shape_cast %41 : vector<1xf32> to vector<1x1xf32>
      %43 = arith.mulf %38, %10 : vector<16x16xf32>
      %44 = arith.mulf %43, %21 : vector<16x16xf32>
      %cst_18 = arith.constant dense<0.000000e+00> : vector<16xf32>
      %45 = vector.multi_reduction <add>, %44, %cst_18 [1] : vector<16x16xf32> to vector<16xf32>
      %46 = vector.shape_cast %45 : vector<16xf32> to vector<16x1xf32>
      %cst_19 = arith.constant dense<0.000000e+00> : vector<1xf32>
      %47 = vector.multi_reduction <add>, %46, %cst_19 [0] : vector<16x1xf32> to vector<1xf32>
      %48 = vector.shape_cast %47 : vector<1xf32> to vector<1x1xf32>
      %49 = arith.addf %38, %10 : vector<16x16xf32>
      %50 = arith.mulf %49, %21 : vector<16x16xf32>
      %cst_20 = arith.constant dense<0.000000e+00> : vector<16xf32>
      %51 = vector.multi_reduction <add>, %50, %cst_20 [1] : vector<16x16xf32> to vector<16xf32>
      %52 = vector.shape_cast %51 : vector<16xf32> to vector<16x1xf32>
      %cst_21 = arith.constant dense<0.000000e+00> : vector<1xf32>
      %53 = vector.multi_reduction <add>, %52, %cst_21 [0] : vector<16x1xf32> to vector<1xf32>
      %54 = vector.shape_cast %53 : vector<1xf32> to vector<1x1xf32>
      %c0_i32_22 = arith.constant 0 : i32
      %55 = vector.broadcast %c0_i32_22 : i32 to vector<1x3xi32>
      %56 = arith.cmpi eq, %2, %55 : vector<1x3xi32>
      %c1_i32_23 = arith.constant 1 : i32
      %57 = vector.broadcast %c1_i32_23 : i32 to vector<1x3xi32>
      %58 = arith.cmpi eq, %2, %57 : vector<1x3xi32>
      %59 = vector.shape_cast %48 : vector<1x1xf32> to vector<1x1xf32>
      %60 = vector.broadcast %59 : vector<1x1xf32> to vector<1x3xf32>
      %61 = vector.shape_cast %54 : vector<1x1xf32> to vector<1x1xf32>
      %62 = vector.broadcast %61 : vector<1x1xf32> to vector<1x3xf32>
      %63 = arith.select %58, %60, %62 : vector<1x3xi1>, vector<1x3xf32>
      %64 = vector.shape_cast %42 : vector<1x1xf32> to vector<1x1xf32>
      %65 = vector.broadcast %64 : vector<1x1xf32> to vector<1x3xf32>
      %66 = arith.select %56, %65, %63 : vector<1x3xi1>, vector<1x3xf32>
      %67 = arith.index_cast %arg6 : i32 to index
      %c0_24 = arith.constant 0 : index
      %c0_25 = arith.constant 0 : index
      %68 = vector.load %arg5[%67, %c0_24, %c0_25] : memref<4x1x3xf32, #tpu.memory_space<vmem>>, vector<1x1x3xf32>
      %69 = vector.shape_cast %68 : vector<1x1x3xf32> to vector<1x3xf32>
      %70 = vector.shape_cast %66 : vector<1x3xf32> to vector<1x1x3xf32>
      tpu.vector_store %arg5[%67, %c0_24, %c0_25], %70 {strides = array<i32>} : memref<4x1x3xf32, #tpu.memory_space<vmem>>, vector<1x1x3xf32>,
    }
    %c4_i32_3 = arith.constant 4 : i32
    return
  }
  func.func @transform_0(%arg0: i32) -> (i32, i32) {
    %c0_i32 = arith.constant 0 : i32
    %c0_i32_0 = arith.constant 0 : i32
    %c0_i32_1 = arith.constant 0 : i32
    return %c0_i32, %c0_i32_0 : i32, i32
  }
  func.func @transform_1(%arg0: i32) -> (i32, i32) {
    %c0_i32 = arith.constant 0 : i32
    %c0_i32_0 = arith.constant 0 : i32
    %c0_i32_1 = arith.constant 0 : i32
    return %c0_i32, %c0_i32_0 : i32, i32
  }
  func.func @transform_2(%arg0: i32) -> (i32, i32, i32) {
    %c0_i32 = arith.constant 0 : i32
    %c0_i32_0 = arith.constant 0 : i32
    %c0_i32_1 = arith.constant 0 : i32
    return %arg0, %c0_i32, %c0_i32_0 : i32, i32, i32
  }
  func.func @transform_3(%arg0: i32) -> (i32, i32, i32) {
    %c0_i32 = arith.constant 0 : i32
    %c0_i32_0 = arith.constant 0 : i32
    %c0_i32_1 = arith.constant 0 : i32
    return %arg0, %c0_i32, %c0_i32_0 : i32, i32, i32
  }
  func.func @transform_4(%arg0: i32) -> (i32, i32, i32) {
    %c0_i32 = arith.constant 0 : i32
    %c0_i32_0 = arith.constant 0 : i32
    %c0_i32_1 = arith.constant 0 : i32
    return %arg0, %c0_i32, %c0_i32_0 : i32, i32, i32
  }
}

</mosaic_0001>

<bundles_post_ra>
// kernel: tpu_custom_call.1
= control target key start
LH: loop header
LB: loop body
LE: loop exit
PB: predicated region body
PF: predicated region fallthrough
CT: control target
= control target key end

     0   :  { %9 = vsyncpa [#allocation3], 0  ;;  %s1269_s0 = inlined_call_operand.hbm [shape: bf16[16,16], index: 0, kind: input, shape index: {}]   ;;  %s1270_s1 = inlined_call_operand.hbm [shape: bf16[16,16], index: 1, kind: input, shape index: {}]   ;;  %s1271_s2 = inlined_call_operand.hbm [shape: f32[8,16,16], index: 2, kind: input, shape index: {}]   ;;  %s1272_s3 = inlined_call_operand.hbm [shape: bf16[8,16,16], index: 3, kind: input, shape index: {}]   ;;  %s1273_s4 = inlined_call_operand.vmem [shape: f32[8,1,3], index: 4, kind: output, shape index: {}]  }
   0x1   :  { %10 = vsyncpa [#allocation5], 0  ;;  %s980_s15 = smov 0   ;;  %s982_s16 = smov 0  }
   0x2   :  { %s984_s17 = smov 0   ;;  %s986_s18 = smov 0  }
   0x3 LB: > { %s999_s19 = sadd.s32 4294967295, %s939_s18   ;;  %s1002_s20 = sadd.s32 1, %s939_s18   ;;  %s939_s18 = sphi %s986_s18, %s1307_s18   ;;  %s935_s17 = sphi %s984_s17, %s1306_s17   ;;  %s931_s16 = sphi %s982_s16, %s1305_s16   ;;  %s927_s15 = sphi %s980_s15, %s1304_s15  }
   0x4   : > { %s62_s21 = ssub.s32 %s939_s18, %s1002_s20  ;;  %s65_s22 = sadd.s32 1, %s935_s17 }
   0x5   : > { %p63_p0 = scmp.eq.s32.totalorder %s62_s21, 0  ;;  %p72_p1 = scmp.ne.s32.totalorder %s935_s17, %s931_s16 }
   0x6   : > { %p73_p2 = scmp.eq.s32.totalorder %s939_s18, 0  ;;  %p78_p3 = scmp.ne.s32.totalorder %s931_s16, %s927_s15 }
   0x7   : > { %s1012_s23 = scalar_select %p63_p0, %s935_s17, %s65_s22  }
   0x8   : > { %p1014_p4 = por %p73_p2, %p72_p1  ;;  %p1274_p5 = scmp.eq.s32.totalorder %s999_s19, 0 }
   0x9   : > { %p635_p6 = scmp.ge.s32.totalorder %s939_s18, 1  ;;  %p141_p7 = scmp.lt.s32.totalorder %s939_s18, 3 }
   0xa   : > { %p1023_p8 = por %p1274_p5, %p78_p3  ;;  %s945_s27 = smov [#allocation2]  }
   0xb   : > { %p1027_p9 = pnand %p635_p6, %p141_p7  ;;  %s153_s28 = sshll.u32 %s945_s27, 4  ;;  %s154_s28 = int_to_ptr.vmem [resolvable:$true] %s153_s28 }
   0xc   : > { %s1286_s25 = scalar_select %p1023_p8, 1, 0 }
   0xd   : > { %s1287_s26 = scalar_select %p1027_p9, 1, 0 }
   0xe   : > { %p696_p10 = pneg %p1027_p9  ;;  %p712_p12 = scmp.lt.s32.totalorder %s939_s18, 2 }
   0xf   : > { %s180_s30 = sand.u32 1, %s939_s18   ;;  %s182_s5 = sand.u32 1, %s935_s17  }
  0x10   : > { %p1035_p11 = pnand %p696_p10, %p1274_p5  ;;  %p1044_p13 = pnand %p712_p12, %p1014_p4 }
  0x11   : > { %s777_s9 = scalar_lea.hbm %s1269_s0, 128 }
  0x12   : > { %s1289_s6 = scalar_select %p1044_p13, 1, 0 }
  0x13   : > { %p778_p0 = scmp.ne.s32.totalorder %s1269_s0, %s777_s9  ;;  %p1278_p1 = pneg %p1035_p11 }
  0x14   : > { %p784_p4 = scmp.lt.u32.totalorder %s777_s9, %s1269_s0 }
  0x15   : > { %p780_p2 = pnand %p1278_p1, %p778_p0 }
  0x17   : > { %p781_p3 = pneg %p780_p2 }
  0x19   : > { %p786_p6 = pnand %p784_p4, %p781_p3 }
  0x1b   : > { %789 = shalt.err (!%p786_p6)
}
  0x1c   : > { %s790_s14 = scalar_lea.vmem %s154_s28, 128  ;;  %p798_p5 = scmp.lt.s32.totalorder %s154_s28, %s154_s28 }
  0x1d   : > { %p791_p7 = scmp.ne.s32.totalorder %s154_s28, %s790_s14  ;;  %p799_p8 = scmp.lt.s32.totalorder %s790_s14, %s790_s14 }
  0x1f   : > { %p793_p10 = pnand %p791_p7, %p1278_p1  ;;  %p800_p9 = por %p799_p8, %p798_p5 }
  0x21   : > { %p794_p12 = pneg %p793_p10 }
  0x23   : > { %p801_p13 = pnand %p800_p9, %p794_p12 }
  0x25   : > { %804 = shalt.err (!%p801_p13)
}
  0x26   : > { %s1279_s15 = smov 64   ;;  %s1281_s21 = smov 4  }
  0x27   : > { %699 = dma.hbm_to_vmem [thread:$0]  (!%p1035_p11), %s1269_s0, 128, %s154_s28, [#allocation3], %s1279_s15, %s1279_s15, %s1281_s21  }
  0x28   : > { %s639_s27 = sshll.u32 %s182_s5, 6  ;;  %s664_s7 = sshll.u32 %s939_s18, 10 }
  0x29   : > { %s1079_s10 = scalar_lea.hbm %s1271_s2, %s664_s7  ;;  %s184_s11 = scalar_lea.vmem [#allocation6], %s639_s27 }
  0x2a   : > { %s192_s12 = sshll.u32 %s184_s11, 4  ;;  %s1083_s13 = scalar_lea.sflag [#allocation3], %s180_s30  ;;  %s1081_s12 = int_to_ptr.vmem [resolvable:$true] %s192_s12 }
  0x2b   : > { %s805_s14 = scalar_lea.hbm %s1079_s10, 1024  ;;  %p1290_p8 = scmp.ne.s32.totalorder %s1289_s6, 0 }
  0x2c   : > { %p806_p5 = scmp.ne.s32.totalorder %s1079_s10, %s805_s14  ;;  %s810_s24 = scalar_lea.hbm %s1271_s2, 2048 }
  0x2d   : > { %p1283_p9 = pneg %p1290_p8  ;;  %p811_p2 = scmp.lt.u32.totalorder %s1079_s10, %s1271_s2 }
  0x2e   : > { %p812_p3 = scmp.lt.u32.totalorder %s810_s24, %s805_s14  ;;  %p814_p6 = scmp.lt.u32.totalorder %s805_s14, %s1079_s10 }
  0x2f   : > { %p808_p13 = pnand %p1283_p9, %p806_p5 }
  0x30   : > { %p813_p4 = por %p812_p3, %p811_p2 }
  0x31   : > { %p809_p0 = pneg %p808_p13 }
  0x32   : > { %p815_p7 = por %p814_p6, %p813_p4 }
  0x34   : > { %p816_p10 = pnand %p815_p7, %p809_p0 }
  0x36   : > { %819 = shalt.err (!%p816_p10)
}
  0x37   : > { %s820_s30 = scalar_lea.vmem %s1081_s12, 1024  ;;  %s948_s27 = smov [#allocation6]  }
  0x38   : > { %p821_p12 = scmp.ne.s32.totalorder %s1081_s12, %s820_s30  ;;  %s825_s9 = sshll.u32 %s948_s27, 4  ;;  %s826_s9 = int_to_ptr.vmem [resolvable:$false] %s825_s9 }
  0x39   : > { %s827_s11 = scalar_lea.vmem %s826_s9, 2048  ;;  %p828_p1 = scmp.lt.s32.totalorder %s1081_s12, %s826_s9 }
  0x3a   : > { %p823_p5 = pnand %p821_p12, %p1283_p9  ;;  %p829_p2 = scmp.lt.s32.totalorder %s827_s11, %s820_s30 }
  0x3c   : > { %p824_p13 = pneg %p823_p5  ;;  %p830_p3 = por %p829_p2, %p828_p1 }
  0x3e   : > { %p831_p4 = pnand %p830_p3, %p824_p13 }
  0x40   : > { %834 = shalt.err (!%p831_p4)
}
  0x41   : > { %s949_s14 = smov 128   ;;  %s950_s28 = smov 8  }
  0x42   : > { %706 = dma.hbm_to_vmem [thread:$0]  (!%p1290_p8), %s1079_s10, 1024, %s1081_s12, %s1083_s13, %s949_s14, %s949_s14, %s950_s28  }
  0x43   : > { %s643_s22 = sshll.u32 %s182_s5, 5  ;;  %s951_s24 = smov [#allocation4]  }
  0x44   : > { %s166_s7 = sshll.u32 %s951_s24, 4  ;;  %s666_s8 = sshll.u32 %s939_s18, 9  ;;  %s167_s7 = int_to_ptr.vmem [resolvable:$true] %s166_s7 }
  0x45   : > { %s835_s9 = scalar_lea.hbm %s1270_s1, 128  ;;  %p1291_p0 = pneg %p1035_p11 }
  0x46   : > { %p836_p1 = scmp.ne.s32.totalorder %s1270_s1, %s835_s9  ;;  %p842_p10 = scmp.lt.u32.totalorder %s835_s9, %s1270_s1 }
  0x48   : > { %p838_p6 = pnand %p836_p1, %p1291_p0 }
  0x4a   : > { %p839_p7 = pneg %p838_p6 }
  0x4c   : > { %p844_p12 = pnand %p842_p10, %p839_p7 }
  0x4e   : > { %847 = shalt.err (!%p844_p12)
}
  0x4f   : > { %s848_s5 = scalar_lea.vmem %s167_s7, 128  ;;  %p1292_p13 = pmov %p1291_p0 }
  0x50   : > { %p849_p5 = scmp.ne.s32.totalorder %s167_s7, %s848_s5  ;;  %p856_p4 = scmp.lt.s32.totalorder %s167_s7, %s167_s7 }
  0x51   : > { %p857_p9 = scmp.lt.s32.totalorder %s848_s5, %s848_s5 }
  0x52   : > { %p851_p2 = pnand %p849_p5, %p1292_p13 }
  0x53   : > { %p858_p8 = por %p857_p9, %p856_p4 }
  0x54   : > { %p852_p3 = pneg %p851_p2 }
  0x56   : > { %p859_p0 = pnand %p858_p8, %p852_p3 }
  0x58   : > { %862 = shalt.err (!%p859_p0)
}
  0x59   : > { %s1293_s18 = smov 4   ;;  %s1294_s15 = smov 64  }
  0x5a   : > { %702 = dma.hbm_to_vmem [thread:$0]  (!%p1035_p11), %s1270_s1, 128, %s167_s7, [#allocation5], %s1294_s15, %s1294_s15, %s1293_s18  }
  0x5b   : > { %s1140_s24 = scalar_lea.hbm %s1272_s3, %s666_s8  ;;  %s206_s30 = scalar_lea.vmem [#allocation7], %s643_s22 }
  0x5c   : > { %s214_s27 = sshll.u32 %s206_s30, 4  ;;  %s863_s29 = scalar_lea.hbm %s1140_s24, 512  ;;  %s1142_s27 = int_to_ptr.vmem [resolvable:$true] %s214_s27 }
  0x5d   : > { %p864_p8 = scmp.ne.s32.totalorder %s1140_s24, %s863_s29  ;;  %p1295_p9 = scmp.ne.s32.totalorder %s1289_s6, 0 }
  0x5e   : > { %s868_s11 = scalar_lea.hbm %s1272_s3, 1024  ;;  %p869_p11 = scmp.lt.u32.totalorder %s1140_s24, %s1272_s3 }
  0x5f   : > { %p1296_p1 = pneg %p1295_p9  ;;  %p870_p10 = scmp.lt.u32.totalorder %s868_s11, %s863_s29 }
  0x60   : > { %p872_p5 = scmp.lt.u32.totalorder %s863_s29, %s1140_s24 }
  0x61   : > { %p866_p6 = pnand %p864_p8, %p1296_p1  ;;  %p871_p12 = por %p870_p10, %p869_p11 }
  0x63   : > { %p867_p7 = pneg %p866_p6  ;;  %p873_p13 = por %p872_p5, %p871_p12 }
  0x65   : > { %p874_p2 = pnand %p873_p13, %p867_p7 }
  0x67   : > { %877 = shalt.err (!%p874_p2)
}
  0x68   : > { %s878_s22 = scalar_lea.vmem %s1142_s27, 512  ;;  %p1297_p4 = pmov %p1296_p1 }
  0x69   : > { %p879_p3 = scmp.ne.s32.totalorder %s1142_s27, %s878_s22  ;;  %s952_s5 = smov [#allocation7]  }
  0x6a   : > { %s883_s21 = sshll.u32 %s952_s5, 4  ;;  %s884_s21 = int_to_ptr.vmem [resolvable:$false] %s883_s21 }
  0x6b   : > { %p881_p0 = pnand %p879_p3, %p1297_p4  ;;  %s885_s12 = scalar_lea.vmem %s884_s21, 1024 }
  0x6c   : > { %p886_p1 = scmp.lt.s32.totalorder %s1142_s27, %s884_s21  ;;  %p887_p6 = scmp.lt.s32.totalorder %s885_s12, %s878_s22 }
  0x6d   : > { %p882_p8 = pneg %p881_p0 }
  0x6e   : > { %p888_p11 = por %p887_p6, %p886_p1 }
  0x70   : > { %p889_p10 = pnand %p888_p11, %p882_p8 }
  0x72   : > { %892 = shalt.err (!%p889_p10)
}
  0x73   : > { %709 = dma.hbm_to_vmem [thread:$0]  (!%p1295_p9), %s1140_s24, 512, %s1142_s27, %s1083_s13, %s1294_s15, %s1294_s15, %s1293_s18  }
  0x74   : > { %p1298_p7 = scmp.ne.s32.totalorder %s1287_s26, 0 }
  0x75   : > { %p1299_p12 = scmp.eq.s32.totalorder (!%p1298_p7), %s999_s19, 0 }
  0x76   : > { %226 = sbr.rel (%p1298_p7) target bundleno = 755 (0x2f3), region = 36 }
  0x7d   : > { %914 = dma.done.wait (%p1299_p12), [#allocation3], 128   ;;  %p1300_p5 = pmov %p1299_p12 }
  0x7f   : > { %916 = vsyncadd (%p1300_p5), [#allocation3], 4294967168  ;;  %p1301_p13 = pmov %p1300_p5 }
  0x80   : > { %p1302_p2 = pmov %p1300_p5 }
  0x81   : > { %918 = dma.done.wait (%p1301_p13), [#allocation5], 128  }
  0x82   : > { %920 = vsyncadd (%p1302_p2), [#allocation5], 4294967168  ;;  %s236_s6 = sand.u32 1, %s999_s19   ;;  %s238_s13 = sand.u32 1, %s931_s16  }
  0x83   : > { %s1183_s18 = sshll.u32 %s238_s13, 6  ;;  %s237_s26 = scalar_lea.sflag [#allocation3], %s236_s6 }
  0x84   : > { %s240_s15 = scalar_lea.vmem [#allocation6], %s1183_s18  ;;  %p1303_p9 = scmp.ne.s32.totalorder %s1286_s25, 0 }
  0x86   : > { %922 = dma.done.wait (%p1303_p9), %s237_s26, 1536  }
  0x87   : > { %924 = vsyncadd (%p1303_p9), %s237_s26, 4294965760  ;;  %s1190_s14 = sshll.u32 %s238_s13, 5  ;;  %s652_s28 = sshll.u32 %s999_s19, 2  ;;  %v290_v0 = vlaneseq  ;;  %v1201_v2 = vld [vmem:[#allocation2] sm:$0xf] }
  0x88   : > { %p281_p3 = scmp.lt.s32.totalorder %s652_s28, 7  ;;  %v1203_v3 = vld [vmem:[#allocation2 + $0x4] sm:$0xf]  ;;  %v1205_v4 = vld [vmem:[#allocation4] sm:$0xf]  ;;  %s249_s19 = scalar_lea.vmem [#allocation7], %s1190_s14 }
  0x89   : > { %v1193_v1 = vand.u32 127, %v290_v0  ;;  %v1207_v5 = vld [vmem:[#allocation4 + $0x4] sm:$0xf]  ;;  %s1210_s25 = smov 0  }
  0x8a   : > { %s1309_s28 = smov (!%p281_p3, %s652_s28), 7 }
  0x8b   : > { %s283_s27 = scalar_lea.vmem %s1273_s4, %s1309_s28 }
  0x8c LB: >> { %v657_v6 = vcombine.low %v1205_v4, %v1207_v5  ;;  %v953_v7 = vmov 0.0   ;;  %vm954_vm0 = vmmov 0   ;;  %s667_s29 = sshll.u32 %s943_s25, 3  ;;  %vm320_vm1 = vcmask 130048   ;;  %s653_s9 = sshll.u32 %s943_s25, 4  ;;  %s943_s25 = sphi %s1210_s25, %s297_s25  }
  0x8d   : >> { %672 = vmatprep.subr.bf16.mxu0 %v953_v7  ;;  %674 = vmatprep.mubr.msk.bf16.mxu0 %vm954_vm0, %v953_v7  ;;  %s304_s7 = scalar_lea.vmem %s249_s19, %s667_s29 [#allocation7]  ;;  %v659_v14 = vcombine.low %v1201_v2, %v1203_v3  ;;  %s299_s11 = scalar_lea.vmem %s240_s15, %s653_s9 [#allocation6]  ;;  %vm517_vm6 = vcmp.eq.s32.totalorder %v1193_v1, 1  ;;  %vm516_vm7 = vcmp.eq.s32.totalorder %v1193_v1, 0  ;;  %vm521_vm8 = vcmask 16384  }
  0x8e   : >> { %673 = vmatpush3.bf16.msra.mxu0 %v657_v6  ;;  %678 = vmatprep.subr.bf16.mxu1 %v953_v7  ;;  %v305_v8 = vld [vmem:[%s304_s7] sm:$0xff]   ;;  %v1229_v16 = vld [vmem:[%s299_s11 + $0x8] sm:$0xff]  ;;  %s520_s22 = scalar_lea.vmem %s283_s27, %s943_s25  ;;  %s297_s25 = sadd.s32 1, %s943_s25  }
  0x8f   : >> { %680 = vmatprep.mubr.msk.bf16.mxu1 %vm954_vm0, %v953_v7  ;;  %v1227_v15 = vld [vmem:[%s299_s11] sm:$0xff]  ;;  %v426_v18 = vand.u32 2147483647, %v1229_v16  ;;  %v307_v30 = vunpack.c.l.bf16 %v305_v8  ;;  %vm464_vm3 = vcmp.ge.f32.partialorder %v1229_v16, 0.0  ;;  %v308_v35 = vunpack.c.h.bf16 %v305_v8  ;;  %p294_p4 = scmp.ge.s32.totalorder %s297_s25, 4  }
  0x90   : >> { %v425_v17 = vand.u32 2147483647, %v1227_v15  ;;  %vm463_vm2 = vcmp.ge.f32.partialorder %v1227_v15, 0.0  ;;  %v434_v56 = vmax.f32 %v1229_v16, 0.0  ;;  %v433_v60 = vmax.f32 %v1227_v15, 0.0 }
  0x91   : >> { %675 = vmatmul.mubr.msk.bf16.vlgmr.msra.gmra.mrb[0].mxu0 %vm320_vm1, %v305_v8  ;;  %v428_v20 = vsub.f32 0.0, %v426_v18  ;;  %v436_v57 = vmul.f32 %v308_v35, %v1229_v16  ;;  %v435_v61 = vmul.f32 %v307_v30, %v1227_v15 }
  0x92   : >> { %v427_v19 = vsub.f32 0.0, %v425_v17 }
  0x93   : >> { %v431_v22 = vmul.f32 1.442695, %v428_v20 }
  0x94   : >> { %v429_v21 = vmul.f32 1.442695, %v427_v19 }
  0x96   : >> { %765 = vpow2.f32 %v429_v21 }
  0x97   : >> { %767 = vpow2.f32 %v431_v22 }
  0xa0   : >> { %v766_v23 = vpop.eup %765 }
  0xa1   : >> { %v768_v24 = vpop.eup %767  ;;  %v439_v25 = vadd.f32 1.0, %v766_v23  ;;  %v442_v34 = vmul.f32 -0.5, %v766_v23  ;;  %v445_v53 = vand.u32 2147483647, %v766_v23 }
  0xa2   : >> { %v448_v26 = vadd.f32 1.0, %v768_v24  ;;  %v451_v33 = vmul.f32 -0.5, %v768_v24  ;;  %v454_v52 = vand.u32 2147483647, %v768_v24 }
  0xa3   : >> { %769 = vrcp.f32 %v439_v25  ;;  %v443_v48 = vadd.f32 1.0, %v442_v34  ;;  %vm446_vm5 = vcmp.lt.f32.partialorder %v445_v53, 0.0004427343 }
  0xa4   : >> { %771 = vrcp.f32 %v448_v26  ;;  %v452_v47 = vadd.f32 1.0, %v451_v33  ;;  %vm455_vm4 = vcmp.lt.f32.partialorder %v454_v52, 0.0004427343 }
  0xa5   : >> { %773 = vlog2.f32 %v448_v26  ;;  %v444_v6 = vmul.f32 %v766_v23, %v443_v48 }
  0xa6   : >> { %775 = vlog2.f32 %v439_v25  ;;  %v453_v63 = vmul.f32 %v768_v24, %v452_v47 }
  0xad   : >> { %v770_v27 = vpop.eup %769 }
  0xae   : >> { %v772_v28 = vpop.eup %771  ;;  %v465_v29 = vmul.f32 %v770_v27, %v766_v23 }
  0xaf   : >> { %v466_v31 = vmul.f32 %v772_v28, %v768_v24  ;;  %v774_v44 = vpop.eup %773 }
  0xb0   : >> { %v467_v38 = vsel %vm463_vm2, %v770_v27, %v465_v29  ;;  %v776_v49 = vpop.eup %775  ;;  %v450_v62 = vmul.f32 0.6931472, %v774_v44 }
  0xb1   : >> { %v468_v43 = vsel %vm464_vm3, %v772_v28, %v466_v31  ;;  %v499_v45 = vadd.f32 %v467_v38, %v307_v30  ;;  %v482_v46 = vmul.f32 %v467_v38, %v307_v30  ;;  %v441_v0 = vmul.f32 0.6931472, %v776_v49 }
  0xb2   : >> { %v500_v54 = vadd.f32 %v468_v43, %v308_v35  ;;  %v483_v55 = vmul.f32 %v468_v43, %v308_v35 }
  0xb3   : >> { %v447_v16 = vsel %vm446_vm5, %v444_v6, %v441_v0 }
 0x164   : >> { %v358_v9 = vpop.f32.mrb[0].mxu0 }
 0x165   : >> { %v676_v10 = vpop.f32.mrb[1].mxu0 }
 0x166   : >> { %v361_v11 = vpop.f32.mrb[2].mxu0 }
 0x167   : >> { %v365_v12 = vpack.c.bf16 %v361_v11, %v358_v9  ;;  %v677_v13 = vpop.f32.mrb[3].mxu0  ;;  %v438_v9 = vsub.f32 %v434_v56, %v436_v57 }
 0x168   : >> { %v437_v13 = vsub.f32 %v433_v60, %v435_v61 }
 0x169   : >> { %679 = vmatpush3.bf16.msra.mxu1 %v365_v12 }
 0x16a   : >> { %v457_v21 = vadd.f32 %v447_v16, %v437_v13 }
 0x16c   : >> { %681 = vmatmul.mubr.msk.bf16.vlgmr.msra.gmra.mrb[0].mxu1 %vm320_vm1, %v659_v14  ;;  %v456_v14 = vsel %vm455_vm4, %v453_v63, %v450_v62  ;;  %v469_v25 = vsel %vm320_vm1, %v457_v21, 0.0 }
 0x16d   : >> { %v458_v20 = vadd.f32 %v456_v14, %v438_v9 }
 0x16f   : >> { %v472_v24 = vsel %vm320_vm1, %v458_v20, 0.0 }
 0x23f   : >> { %v408_v32 = vpop.f32.mrb[0].mxu1 }
 0x240   : >> { %v415_v36 = vmul.f32 0.0010405828, %v408_v32  ;;  %v682_v37 = vpop.f32.mrb[1].mxu1 }
 0x241   : >> { %v411_v39 = vpop.f32.mrb[2].mxu1 }
 0x242   : >> { %v417_v40 = vsub.f32 %v415_v36, %v307_v30  ;;  %v416_v41 = vmul.f32 0.0010405828, %v411_v39  ;;  %v683_v42 = vpop.f32.mrb[3].mxu1 }
 0x244   : >> { %v419_v50 = vand.u32 2147483647, %v417_v40  ;;  %v418_v51 = vsub.f32 %v416_v41, %v308_v35 }
 0x246   : >> { %v421_v58 = vmul.f32 5.0, %v419_v50  ;;  %v420_v59 = vand.u32 2147483647, %v418_v51 }
 0x248   : >> { %v422_v7 = vmul.f32 5.0, %v420_v59  ;;  %v423_v8 = vadd.f32 1.0, %v421_v58 }
 0x24a   : >> { %v424_v10 = vadd.f32 1.0, %v422_v7  ;;  %v501_v11 = vmul.f32 %v499_v45, %v423_v8  ;;  %v484_v12 = vmul.f32 %v482_v46, %v423_v8 }
 0x24c   : >> { %v503_v17 = vsel %vm320_vm1, %v501_v11, 0.0  ;;  %v486_v18 = vsel %vm320_vm1, %v484_v12, 0.0  ;;  %v502_v15 = vmul.f32 %v500_v54, %v424_v10  ;;  %v485_v19 = vmul.f32 %v483_v55, %v424_v10 }
 0x24d   : >> { %504 = vadd.xlane.f32.xlu1 %v503_v17  ;;  %487 = vadd.xlane.f32.xlu0 %v486_v18 }
 0x24e   : >> { %v506_v22 = vsel %vm320_vm1, %v502_v15, 0.0  ;;  %v489_v23 = vsel %vm320_vm1, %v485_v19, 0.0 }
 0x251   : >> { %507 = vadd.xlane.f32.xlu1 %v506_v22  ;;  %490 = vadd.xlane.f32.xlu0 %v489_v23 }
 0x255   : >> { %473 = vadd.xlane.f32.xlu1 %v472_v24  ;;  %470 = vadd.xlane.f32.xlu0 %v469_v25 }
 0x2da   : >> { %v505_v26 = vpop.xlane.xlu1 %504  ;;  %v488_v27 = vpop.xlane.xlu0 %487 }
 0x2de   : >> { %v508_v28 = vpop.xlane.xlu1 %507  ;;  %v491_v29 = vpop.xlane.xlu0 %490 }
 0x2df   : >> { %v509_v30 = vadd.f32 %v508_v28, %v505_v26  ;;  %v492_v31 = vadd.f32 %v491_v29, %v488_v27 }
 0x2e1   : >> { %v510_v32 = vrot.slane %v509_v30, 4  ;;  %v493_v33 = vrot.slane %v492_v31, 4 }
 0x2e2   : >> { %v474_v34 = vpop.xlane.xlu1 %473  ;;  %v471_v35 = vpop.xlane.xlu0 %470 }
 0x2e3   : >> { %v511_v36 = vadd.f32 %v510_v32, %v509_v30  ;;  %v494_v37 = vadd.f32 %v493_v33, %v492_v31  ;;  %v475_v38 = vadd.f32 %v474_v34, %v471_v35 }
 0x2e5   : >> { %v512_v39 = vrot.slane %v511_v36, 2  ;;  %v495_v40 = vrot.slane %v494_v37, 2  ;;  %v476_v41 = vrot.slane %v475_v38, 4 }
 0x2e7   : >> { %v513_v42 = vadd.f32 %v512_v39, %v511_v36  ;;  %v496_v43 = vadd.f32 %v495_v40, %v494_v37  ;;  %v477_v44 = vadd.f32 %v476_v41, %v475_v38 }
 0x2e9   : >> { %v514_v45 = vrot.slane %v513_v42, 1  ;;  %v497_v46 = vrot.slane %v496_v43, 1  ;;  %v478_v47 = vrot.slane %v477_v44, 2 }
 0x2eb   : >> { %v479_v48 = vadd.f32 %v478_v47, %v477_v44  ;;  %v515_v49 = vadd.f32 %v514_v45, %v513_v42  ;;  %v498_v50 = vadd.f32 %v497_v46, %v496_v43 }
 0x2ec   : > { %296 = sbr.rel (!%p294_p4) target bundleno = 140 (0x8c), region = 104 }
 0x2ed   : >> { %v480_v51 = vrot.slane %v479_v48, 1  ;;  %v518_v53 = vsel %vm517_vm6, %v498_v50, %v515_v49 }
 0x2ef   : >> { %v481_v52 = vadd.f32 %v480_v51, %v479_v48 }
 0x2f1   : >> { %v519_v54 = vsel %vm516_vm7, %v481_v52, %v518_v53 }
 0x2f2   : >> { %522 = vst.msk [vmem:[%s520_s22] sm:$0x1] %vm521_vm8, %v519_v54 }
 0x2f3 PF: > { %p13_p0 = scmp.ge.s32.totalorder %s1002_s20, 4   ;;  %s1304_s15 = smov %s931_s16 }
 0x2f4   : > { %s1305_s16 = smov %s935_s17  ;;  %s1306_s17 = smov %s1012_s23 }
 0x2f5   : > { %s1307_s18 = smov %s1002_s20  ;;  %15 = sbr.rel (!%p13_p0) target bundleno = 3 (0x3), region = 115 }
 0x2fc   :  { %543 = vsyncpa [#allocation3], 1 }
 0x2fd   :  { %545 = vsyncpa [#allocation3 + $0x1], 1 }
 0x2fe   :  { %546 = vsyncpa [#allocation5], 1 }

</bundles_post_ra>
